<compile_context>
chip_gen: v6e
topology: v6e:2x2x1
jax: 0.10.0
libtpu: 0.0.40
codegen_flags: <defaults>
</compile_context>

<pallas_src>
import functools
import math

import jax
import jax.numpy as jnp
from jax.experimental import pallas as pl
from jax.experimental.pallas import tpu as pltpu

LANE = 128
SUBLANE = 8


def _mse_kernel(pred_ref, gt_ref, out_ref, acc_ref, *,
                total_n, total_rows, block_rows, needs_mask):
    i = pl.program_id(0)

    @pl.when(i == 0)
    def _():
        acc_ref[...] = jnp.zeros_like(acc_ref)

    diff = pred_ref[...].astype(jnp.float32) - gt_ref[...].astype(jnp.float32)
    sq = diff * diff

    if needs_mask:
        # Partial last block: rows at/after `total_rows` hold stale VMEM data;
        # zero them out.  (All-true on full blocks, so safe to apply everywhere.)
        row_ids = jax.lax.broadcasted_iota(jnp.int32, sq.shape, 0) + i * block_rows
        sq = jnp.where(row_ids < total_rows, sq, jnp.float32(0.0))

    # Fold the (block_rows, 128) tile onto the (8, 128) accumulator:
    # pure vreg-wise adds on the VPU, no cross-lane work in the hot loop.
    acc_ref[...] += jnp.sum(sq.reshape(-1, SUBLANE, LANE), axis=0)

    @pl.when(i == pl.num_programs(0) - 1)
    def _():
        out_ref[0, 0] = jnp.sum(acc_ref[...]) / jnp.float32(total_n)


def reconstructor_loss(pred, gt, *, block_rows=2048):
    """Mean squared error over all elements, computed in a Pallas TPU kernel."""
    assert pred.shape == gt.shape, "pred and gt must have the same shape"
    n = int(math.prod(pred.shape))

    # Flatten (free for contiguous arrays); keep original dtype through the DMA.
    p = pred.reshape(-1)
    g = gt.reshape(-1)

    # Only pad when the flat length isn't a multiple of one (8, 128) tile.
    # Zero padding contributes 0 to the squared-diff sum; the mean divides by n.
    sub_tile = SUBLANE * LANE
    pad = (-n) % sub_tile
    if pad:
        p = jnp.pad(p, (0, pad))
        g = jnp.pad(g, (0, pad))

    rows = (n + pad) // LANE  # multiple of 8
    p = p.reshape(rows, LANE)
    g = g.reshape(rows, LANE)

    # Tile size: multiple of 8 sublanes, clamped so small inputs run in one step.
    block_rows = max(SUBLANE, (int(block_rows) // SUBLANE) * SUBLANE)
    block_rows = min(block_rows, rows)
    num_blocks = pl.cdiv(rows, block_rows)
    needs_mask = (rows % block_rows) != 0

    kernel = functools.partial(
        _mse_kernel,
        total_n=n,
        total_rows=rows,
        block_rows=block_rows,
        needs_mask=needs_mask,
    )

    out = pl.pallas_call(
        kernel,
        out_shape=jax.ShapeDtypeStruct((1, 1), jnp.float32),
        grid=(num_blocks,),
        in_specs=[
            pl.BlockSpec((block_rows, LANE), lambda i: (i, 0)),
            pl.BlockSpec((block_rows, LANE), lambda i: (i, 0)),
        ],
        out_specs=pl.BlockSpec((1, 1), lambda i: (0, 0), memory_space=pltpu.SMEM),
        scratch_shapes=[pltpu.VMEM((SUBLANE, LANE), jnp.float32)],
        compiler_params=pltpu.CompilerParams(dimension_semantics=("arbitrary",)),
    )(p, g)

    return out[0, 0]


if __name__ == "__main__":
    key = jax.random.PRNGKey(0)
    k1, k2 = jax.random.split(key)

    # Small shapes consistent with a reconstruction loss on images (NCHW).
    pred = jax.random.normal(k1, (2, 4, 16, 16), dtype=jnp.float32)
    gt = jax.random.normal(k2, (2, 4, 16, 16), dtype=jnp.float32)

    loss = reconstructor_loss(pred, gt)
    loss = jax.block_until_ready(loss)

    # Reference check (same semantics as torch.mean(F.mse_loss(..., reduce=False))).
    ref = jnp.mean((pred - gt) ** 2)
    assert jnp.allclose(loss, ref, rtol=1e-6, atol=1e-6), (loss, ref)

    print("KERNEL_OK")
</pallas_src>

<mosaic_0001>
module attributes {stable_mosaic.version = 11 : i64} {
  func.func @_mse_kernel(%arg0: i32, %arg1: memref<16x128xf32, #tpu.memory_space<vmem>>, %arg2: memref<16x128xf32, #tpu.memory_space<vmem>>, %arg3: memref<1x1xf32, #tpu.memory_space<smem>>, %arg4: memref<8x128xf32, #tpu.memory_space<vmem>>) attributes {dimension_semantics = [#tpu.dimension_semantics<arbitrary>], iteration_bounds = array<i64: 1>, scalar_prefetch = 0 : i64, scratch_operands = 1 : i64, tpu.core_type = #tpu.core_type<tc>, window_params = [{transform_indices = @transform_0, window_bounds = array<i64: 16, 128>}, {transform_indices = @transform_1, window_bounds = array<i64: 16, 128>}, {transform_indices = @transform_2, window_bounds = array<i64: 1, 1>}]} {
    %c0_i32 = arith.constant 0 : i32
    %0 = arith.cmpi eq, %arg0, %c0_i32 : i32
    %1 = arith.extui %0 : i1 to i32
    %c0_i32_0 = arith.constant 0 : i32
    %2 = arith.cmpi ne, %1, %c0_i32_0 : i32
    scf.if %2 {
      %cst_10 = arith.constant 0.000000e+00 : f32
      %15 = vector.broadcast %cst_10 : f32 to vector<8x128xf32>
      %c0_11 = arith.constant 0 : index
      %c0_12 = arith.constant 0 : index
      %16 = vector.load %arg4[%c0_11, %c0_12] : memref<8x128xf32, #tpu.memory_space<vmem>>, vector<8x128xf32>
      tpu.vector_store %arg4[%c0_11, %c0_12], %15 {strides = array<i32>} : memref<8x128xf32, #tpu.memory_space<vmem>>, vector<8x128xf32>,
    } else {
    }
    %c0 = arith.constant 0 : index
    %c0_1 = arith.constant 0 : index
    %3 = vector.load %arg1[%c0, %c0_1] : memref<16x128xf32, #tpu.memory_space<vmem>>, vector<16x128xf32>
    %c0_2 = arith.constant 0 : index
    %c0_3 = arith.constant 0 : index
    %4 = vector.load %arg2[%c0_2, %c0_3] : memref<16x128xf32, #tpu.memory_space<vmem>>, vector<16x128xf32>
    %5 = arith.subf %3, %4 : vector<16x128xf32>
    %6 = arith.mulf %5, %5 : vector<16x128xf32>
    %c0_4 = arith.constant 0 : index
    %c0_5 = arith.constant 0 : index
    %7 = vector.load %arg4[%c0_4, %c0_5] : memref<8x128xf32, #tpu.memory_space<vmem>>, vector<8x128xf32>
    %8 = vector.shape_cast %6 : vector<16x128xf32> to vector<2x8x128xf32>
    %cst = arith.constant dense<0.000000e+00> : vector<8x128xf32>
    %9 = vector.multi_reduction <add>, %8, %cst [0] : vector<2x8x128xf32> to vector<8x128xf32>
    %10 = arith.addf %7, %9 : vector<8x128xf32>
    %c0_6 = arith.constant 0 : index
    %c0_7 = arith.constant 0 : index
    %11 = vector.load %arg4[%c0_6, %c0_7] : memref<8x128xf32, #tpu.memory_space<vmem>>, vector<8x128xf32>
    tpu.vector_store %arg4[%c0_6, %c0_7], %10 {strides = array<i32>} : memref<8x128xf32, #tpu.memory_space<vmem>>, vector<8x128xf32>,
    %c0_i32_8 = arith.constant 0 : i32
    %12 = arith.cmpi eq, %arg0, %c0_i32_8 : i32
    %13 = arith.extui %12 : i1 to i32
    %c0_i32_9 = arith.constant 0 : i32
    %14 = arith.cmpi ne, %13, %c0_i32_9 : i32
    scf.if %14 {
      %c0_10 = arith.constant 0 : index
      %c0_11 = arith.constant 0 : index
      %15 = vector.load %arg4[%c0_10, %c0_11] : memref<8x128xf32, #tpu.memory_space<vmem>>, vector<8x128xf32>
      %16 = vector.shape_cast %15 : vector<8x128xf32> to vector<1x8x128xf32>
      %cst_12 = arith.constant dense<0.000000e+00> : vector<1xf32>
      %17 = vector.multi_reduction <add>, %16, %cst_12 [1, 2] : vector<1x8x128xf32> to vector<1xf32>
      %18 = vector.shape_cast %17 : vector<1xf32> to vector<1x1x1xf32>
      %19 = vector.extract %18[0, 0, 0] : f32 from vector<1x1x1xf32>
      %cst_13 = arith.constant 2.048000e+03 : f32
      %20 = arith.divf %19, %cst_13 : f32
      %c0_14 = arith.constant 0 : index
      %c0_15 = arith.constant 0 : index
      %21 = memref.load %arg3[%c0_14, %c0_15] : memref<1x1xf32, #tpu.memory_space<smem>>
      memref.store %20, %arg3[%c0_14, %c0_15] : memref<1x1xf32, #tpu.memory_space<smem>>
    } else {
    }
    return
  }
  func.func @transform_0(%arg0: i32) -> (i32, i32) {
    %c0_i32 = arith.constant 0 : i32
    %c0_i32_0 = arith.constant 0 : i32
    return %arg0, %c0_i32 : i32, i32
  }
  func.func @transform_1(%arg0: i32) -> (i32, i32) {
    %c0_i32 = arith.constant 0 : i32
    %c0_i32_0 = arith.constant 0 : i32
    return %arg0, %c0_i32 : i32, i32
  }
  func.func @transform_2(%arg0: i32) -> (i32, i32) {
    %c0_i32 = arith.constant 0 : i32
    %c0_i32_0 = arith.constant 0 : i32
    %c0_i32_1 = arith.constant 0 : i32
    return %c0_i32, %c0_i32_0 : i32, i32
  }
}

</mosaic_0001>

<bundles_post_ra>
// kernel: tpu_custom_call.1
= control target key start
LH: loop header
LB: loop body
LE: loop exit
PB: predicated region body
PF: predicated region fallthrough
CT: control target
= control target key end

     0   :  { %7 = vsyncpa [#allocation4], 0  ;;  %s180_s0 = inlined_call_operand.hbm [shape: f32[16,128], index: 0, kind: input, shape index: {}]   ;;  %s181_s1 = inlined_call_operand.hbm [shape: f32[16,128], index: 1, kind: input, shape index: {}]   ;;  %s182_s2 = inlined_call_operand.hbm [shape: f32[1,1], index: 2, kind: output, shape index: {}]  }
   0x1   :  { %8 = vsyncpa [#allocation7], 0 }
   0x2   :  { %9 = vsyncpa [#allocation5], 0  ;;  %s151_s9 = smov [#allocation3]  }
   0x3   :  { %s15_s10 = sshll.u32 %s151_s9, 4  ;;  %s16_s10 = int_to_ptr.vmem [resolvable:$true] %s15_s10 }
   0x4   :  { %s105_s11 = scalar_lea.vmem %s16_s10, 256  ;;  %p110_p1 = scmp.lt.s32.totalorder %s16_s10, %s16_s10 }
   0x5   :  { %p106_p0 = scmp.ne.s32.totalorder %s16_s10, %s105_s11  ;;  %p111_p2 = scmp.lt.s32.totalorder %s105_s11, %s105_s11 }
   0x7   :  { %p112_p3 = por %p111_p2, %p110_p1 }
   0x9   :  { %p113_p4 = pnand %p112_p3, %p106_p0 }
   0xb   :  { %116 = shalt.err (!%p113_p4)
}
   0xc   :  { %s152_s12 = smov 128   ;;  %s153_s13 = smov 8  }
   0xd   :  { %21 = dma.hbm_to_vmem [thread:$0]  %s180_s0, 256, %s16_s10, [#allocation4], %s152_s12, %s152_s12, %s153_s13  }
   0xe   :  { %s154_s16 = smov [#allocation6]  }
   0xf   :  { %s27_s17 = sshll.u32 %s154_s16, 4  ;;  %s28_s17 = int_to_ptr.vmem [resolvable:$true] %s27_s17 }
  0x10   :  { %s125_s18 = scalar_lea.vmem %s28_s17, 256  ;;  %p130_p6 = scmp.lt.s32.totalorder %s28_s17, %s28_s17 }
  0x11   :  { %p126_p5 = scmp.ne.s32.totalorder %s28_s17, %s125_s18  ;;  %p131_p7 = scmp.lt.s32.totalorder %s125_s18, %s125_s18 }
  0x13   :  { %p132_p8 = por %p131_p7, %p130_p6 }
  0x15   :  { %p133_p9 = pnand %p132_p8, %p126_p5 }
  0x17   :  { %136 = shalt.err (!%p133_p9)
}
  0x18   :  { %33 = dma.hbm_to_vmem [thread:$0]  %s181_s1, 256, %s28_s17, [#allocation7], %s152_s12, %s152_s12, %s153_s13  }
  0x19   :  { %145 = dma.done.wait [#allocation4], 256  }
  0x1a   :  { %146 = vsyncadd [#allocation4], 4294967040 }
  0x1b   :  { %147 = dma.done.wait [#allocation7], 256  }
  0x1c   :  { %148 = vsyncadd [#allocation7], 4294967040  ;;  %v45_v0 = vld [vmem:[#allocation3] sm:$0xff]  ;;  %v46_v1 = vld [vmem:[#allocation3 + $0x8] sm:$0xff]  ;;  %s155_s21 = smov [#allocation8]  }
  0x1d   :  { %v47_v2 = vld [vmem:[#allocation6] sm:$0xff]  ;;  %v48_v3 = vld [vmem:[#allocation6 + $0x8] sm:$0xff] }
  0x1e   :  { %v49_v4 = vsub.f32 %v45_v0, %v47_v2  ;;  %v50_v5 = vsub.f32 %v46_v1, %v48_v3 }
  0x20   :  { %v51_v6 = vmul.f32 %v49_v4, %v49_v4  ;;  %v52_v7 = vmul.f32 %v50_v5, %v50_v5 }
  0x22   :  { %v54_v8 = vadd.f32 %v52_v7, %v51_v6 }
  0x24   :  { %61 = vadd.xlane.f32.xlu0 %v54_v8 }
  0xad   :  { %v62_v9 = vpop.xlane.xlu0 %61 }
  0xae   :  { %v63_v10 = vrot.slane %v62_v9, 4 }
  0xb0   :  { %v64_v11 = vadd.f32 %v63_v10, %v62_v9 }
  0xb2   :  { %v65_v12 = vrot.slane %v64_v11, 2 }
  0xb4   :  { %v66_v13 = vadd.f32 %v65_v12, %v64_v11 }
  0xb6   :  { %v67_v14 = vrot.slane %v66_v13, 1 }
  0xb8   :  { %v68_v15 = vadd.f32 %v67_v14, %v66_v13 }
  0xba   :  { %90 = vpush %v68_v15 }
  0xeb   :  { %s91_s0 = spop %90 }
  0xec   :  { %s72_s1 = smul.f32 0.00048828125, %s91_s0 }
  0xee   :  { %74 = sst [smem:[#allocation8]] %s72_s1 }
  0xef   :  { %82 = dma.smem_to_hbm %s155_s21, 16, %s182_s2, [#allocation5]  }
  0xf0   :  { %149 = dma.done.wait [#allocation5], 16  }
  0xf1   :  { %150 = vsyncadd [#allocation5], 4294967280 }
  0xf2   :  { %86 = sfence }
  0xf3   :  { %87 = vsyncpa [#allocation4], 1 }
  0xf4   :  { %88 = vsyncpa [#allocation7], 1 }
  0xf5   :  { %89 = vsyncpa [#allocation5], 1 }

</bundles_post_ra>
